<compile_context>
chip_gen: v5e
topology: v5e:2x2
jax: 0.10.0
libtpu: 0.0.40
codegen_flags: <defaults>
</compile_context>

<pallas_src>
import functools

import jax
import jax.numpy as jnp
from jax.experimental import pallas as pl
from jax.experimental.pallas import tpu as pltpu

LANE = 128  # padded width of the hidden layers inside the param slab


def _round_up(n, m):
    return ((n + m - 1) // m) * m


def _batch_tiling(batch):
    """Pick (b_pad, TB) so b_pad % TB == 0 and TB is a multiple of 8."""
    b8 = _round_up(batch, 8)
    if b8 <= 256:
        # Single grid step: launch/DMA-latency dominated, extra steps are pure
        # overhead (and v5e/v6e have a single TensorCore anyway).
        return b8, b8
    # >=2 grid steps so the "parallel" batch axis can shard across both v7x
    # TensorCores; cap the tile at 1024 rows (still tiny in VMEM).
    tb = min(1024, _round_up(pl.cdiv(b8, 2), 8))
    b_pad = _round_up(b8, tb)
    return b_pad, tb


def dqn_kernel(x_ref, w_ref, o_ref, *, in_dim, out_dim):
    # x_ref: (TB, in_dim)   w_ref: (4, 128, 128)   o_ref: (TB, out_dim)
    # w_ref planes: 0 = W1 (rows 0..in_dim-1), 1 = W2, 2 = W3 (cols 0..out_dim-1),
    #               3 = biases (row 0 = b1, row 1 = b2, row 2 = b3).
    f32 = jnp.float32
    wd = w_ref.dtype
    x = x_ref[...].astype(wd)

    # fc1 + tanh: contract over the true in_dim rows only (no padded x lanes).
    h1 = jnp.tanh(
        jnp.dot(x, w_ref[0, :in_dim, :], preferred_element_type=f32)
        + w_ref[3, 0:1, :].astype(f32)
    )
    # fc2 + relu (padded rows/cols of W2/b2 are zero -> padded lanes stay 0).
    h2 = jnp.maximum(
        jnp.dot(h1.astype(wd), w_ref[1], preferred_element_type=f32)
        + w_ref[3, 1:2, :].astype(f32),
        0.0,
    )
    # fc3: only the real output columns are computed / stored (lane-narrow out).
    o_ref[...] = (
        jnp.dot(h2.astype(wd), w_ref[2, :, :out_dim], preferred_element_type=f32)
        + w_ref[3, 2:3, :out_dim].astype(f32)
    ).astype(o_ref.dtype)


def pack_params(w1, b1, w2, b2, w3, b3, param_dtype=jnp.float32):
    """Zero-pad every layer to 128x128 and pack W1/W2/W3 + biases into ONE slab.

    Done once at init so the per-step kernel has exactly one parameter DMA.
    Padded rows/columns are exactly zero so padded lanes never leak.
    """
    slab = jnp.zeros((4, LANE, LANE), param_dtype)
    slab = slab.at[0, : w1.shape[0], : w1.shape[1]].set(w1.astype(param_dtype))
    slab = slab.at[1, : w2.shape[0], : w2.shape[1]].set(w2.astype(param_dtype))
    slab = slab.at[2, : w3.shape[0], : w3.shape[1]].set(w3.astype(param_dtype))
    slab = slab.at[3, 0, : b1.size].set(b1.reshape(-1).astype(param_dtype))
    slab = slab.at[3, 1, : b2.size].set(b2.reshape(-1).astype(param_dtype))
    slab = slab.at[3, 2, : b3.size].set(b3.reshape(-1).astype(param_dtype))
    return slab


@functools.partial(jax.jit, static_argnames=("in_dim", "out_dim"))
def dqn_forward(x, w_slab, *, in_dim, out_dim):
    B = x.shape[0]
    b_pad, tb = _batch_tiling(B)
    x_p = x if b_pad == B else jnp.pad(x, ((0, b_pad - B), (0, 0)))

    cost = pl.CostEstimate(
        flops=2 * B * (in_dim * 20 + 20 * 10 + 10 * out_dim),
        transcendentals=B * 20,  # tanh
        bytes_accessed=(
            x_p.dtype.itemsize * x_p.size
            + w_slab.dtype.itemsize * w_slab.size
            + 4 * b_pad * out_dim
        ),
    )

    out_p = pl.pallas_call(
        functools.partial(dqn_kernel, in_dim=in_dim, out_dim=out_dim),
        out_shape=jax.ShapeDtypeStruct((b_pad, out_dim), jnp.float32),
        grid=(b_pad // tb,),
        in_specs=[
            # x streamed with its natural feature width (full last dim is legal).
            pl.BlockSpec((tb, in_dim), lambda i: (i, 0)),
            # single parameter slab, constant index_map -> VMEM-resident.
            pl.BlockSpec((4, LANE, LANE), lambda i: (0, 0, 0)),
        ],
        # lane-narrow output: only the real out_dim columns are written back.
        out_specs=pl.BlockSpec((tb, out_dim), lambda i: (i, 0)),
        compiler_params=pltpu.CompilerParams(
            dimension_semantics=("parallel",),
        ),
        cost_estimate=cost,
    )(x_p, w_slab)
    return out_p[:B]


def init_linear(key, fan_in, fan_out):
    """PyTorch-style default init: U(-1/sqrt(fan_in), 1/sqrt(fan_in))."""
    kw, kb = jax.random.split(key)
    bound = 1.0 / jnp.sqrt(jnp.float32(fan_in))
    # stored as [in, out] (transpose of torch's [out, in])
    w = jax.random.uniform(kw, (fan_in, fan_out), jnp.float32, -bound, bound)
    b = jax.random.uniform(kb, (1, fan_out), jnp.float32, -bound, bound)
    return w, b


def _reference(x, w1, b1, w2, b2, w3, b3):
    h = jnp.tanh(x @ w1 + b1)
    h = jnp.maximum(h @ w2 + b2, 0.0)
    return h @ w3 + b3


if __name__ == "__main__":
    inputs, outputs = 32, 4  # DQN(inputs=32, outputs=4)

    root = jax.random.PRNGKey(0)
    kx1, kx2, k1, k2, k3 = jax.random.split(root, 5)

    w1, b1 = init_linear(k1, inputs, 20)
    w2, b2 = init_linear(k2, 20, 10)
    w3, b3 = init_linear(k3, 10, outputs)

    # Pack/pad all parameters once at init time into a single DMA slab.
    w_slab = pack_params(w1, b1, w2, b2, w3, b3)  # f32 for exact torch parity

    # Case 1: medium batch -> 2 "parallel" grid steps (exercises pipelining /
    # v7x megacore sharding).
    x_big = jax.random.normal(kx1, (512, inputs), jnp.float32)
    out_big = jax.block_until_ready(
        dqn_forward(x_big, w_slab, in_dim=inputs, out_dim=outputs)
    )
    ref_big = _reference(x_big, w1, b1, w2, b2, w3, b3)
    assert out_big.shape == (512, outputs)
    assert jnp.allclose(out_big, ref_big, atol=1e-5, rtol=1e-5)

    # Case 2: small, non-multiple-of-8 batch -> single grid step + row padding.
    x_small = jax.random.normal(kx2, (37, inputs), jnp.float32)
    out_small = jax.block_until_ready(
        dqn_forward(x_small, w_slab, in_dim=inputs, out_dim=outputs)
    )
    ref_small = _reference(x_small, w1, b1, w2, b2, w3, b3)
    assert out_small.shape == (37, outputs)
    assert jnp.allclose(out_small, ref_small, atol=1e-5, rtol=1e-5)

    print("KERNEL_OK")
</pallas_src>

<mosaic_0001>
module attributes {stable_mosaic.version = 11 : i64} {
  func.func @dqn_kernel(%arg0: i32, %arg1: memref<256x32xf32, #tpu.memory_space<vmem>>, %arg2: memref<4x128x128xf32, #tpu.memory_space<vmem>>, %arg3: memref<256x4xf32, #tpu.memory_space<vmem>>) attributes {dimension_semantics = [#tpu.dimension_semantics<parallel>], iteration_bounds = array<i64: 2>, scalar_prefetch = 0 : i64, scratch_operands = 0 : i64, tpu.core_type = #tpu.core_type<tc>, window_params = [{transform_indices = @transform_0, window_bounds = array<i64: 256, 32>}, {pipeline_mode = #tpu.pipeline_mode<synchronous>, transform_indices = @transform_1, window_bounds = array<i64: 4, 128, 128>}, {transform_indices = @transform_2, window_bounds = array<i64: 256, 4>}]} {
    %c0 = arith.constant 0 : index
    %c0_0 = arith.constant 0 : index
    %0 = vector.load %arg1[%c0, %c0_0] : memref<256x32xf32, #tpu.memory_space<vmem>>, vector<256x32xf32>
    %c0_1 = arith.constant 0 : index
    %c0_2 = arith.constant 0 : index
    %c0_3 = arith.constant 0 : index
    %1 = vector.load %arg2[%c0_1, %c0_2, %c0_3] : memref<4x128x128xf32, #tpu.memory_space<vmem>>, vector<1x32x128xf32>
    %2 = vector.shape_cast %1 : vector<1x32x128xf32> to vector<32x128xf32>
    %cst = arith.constant dense<0.000000e+00> : vector<256x128xf32>
    %3 = tpu.matmul %0, %2, %cst {dimension_numbers = #tpu.dot_dimension_numbers<[1], [0], [0], [1], [0, 0, 1, 1], [], []>} : vector<256x32xf32>, vector<32x128xf32>, vector<256x128xf32> -> vector<256x128xf32>
    %c3 = arith.constant 3 : index
    %c0_4 = arith.constant 0 : index
    %c0_5 = arith.constant 0 : index
    %4 = vector.load %arg2[%c3, %c0_4, %c0_5] : memref<4x128x128xf32, #tpu.memory_space<vmem>>, vector<1x1x128xf32>
    %5 = vector.shape_cast %4 : vector<1x1x128xf32> to vector<1x128xf32>
    %6 = vector.broadcast %5 : vector<1x128xf32> to vector<256x128xf32>
    %7 = arith.addf %3, %6 : vector<256x128xf32>
    %8 = math.tanh %7 : vector<256x128xf32>
    %c1 = arith.constant 1 : index
    %c0_6 = arith.constant 0 : index
    %c0_7 = arith.constant 0 : index
    %9 = vector.load %arg2[%c1, %c0_6, %c0_7] : memref<4x128x128xf32, #tpu.memory_space<vmem>>, vector<1x128x128xf32>
    %10 = vector.shape_cast %9 : vector<1x128x128xf32> to vector<128x128xf32>
    %cst_8 = arith.constant dense<0.000000e+00> : vector<256x128xf32>
    %11 = tpu.matmul %8, %10, %cst_8 {dimension_numbers = #tpu.dot_dimension_numbers<[1], [0], [0], [1], [0, 0, 1, 1], [], []>} : vector<256x128xf32>, vector<128x128xf32>, vector<256x128xf32> -> vector<256x128xf32>
    %c3_9 = arith.constant 3 : index
    %c1_10 = arith.constant 1 : index
    %c0_11 = arith.constant 0 : index
    %12 = vector.load %arg2[%c3_9, %c1_10, %c0_11] : memref<4x128x128xf32, #tpu.memory_space<vmem>>, vector<1x1x128xf32>
    %13 = vector.shape_cast %12 : vector<1x1x128xf32> to vector<1x128xf32>
    %14 = vector.broadcast %13 : vector<1x128xf32> to vector<256x128xf32>
    %15 = arith.addf %11, %14 : vector<256x128xf32>
    %cst_12 = arith.constant 0.000000e+00 : f32
    %16 = vector.broadcast %cst_12 : f32 to vector<256x128xf32>
    %17 = arith.maximumf %15, %16 : vector<256x128xf32>
    %c2 = arith.constant 2 : index
    %c0_13 = arith.constant 0 : index
    %c0_14 = arith.constant 0 : index
    %18 = vector.load %arg2[%c2, %c0_13, %c0_14] : memref<4x128x128xf32, #tpu.memory_space<vmem>>, vector<1x128x4xf32>
    %19 = vector.shape_cast %18 : vector<1x128x4xf32> to vector<128x4xf32>
    %cst_15 = arith.constant dense<0.000000e+00> : vector<256x4xf32>
    %20 = tpu.matmul %17, %19, %cst_15 {dimension_numbers = #tpu.dot_dimension_numbers<[1], [0], [0], [1], [0, 0, 1, 1], [], []>} : vector<256x128xf32>, vector<128x4xf32>, vector<256x4xf32> -> vector<256x4xf32>
    %c3_16 = arith.constant 3 : index
    %c2_17 = arith.constant 2 : index
    %c0_18 = arith.constant 0 : index
    %21 = vector.load %arg2[%c3_16, %c2_17, %c0_18] : memref<4x128x128xf32, #tpu.memory_space<vmem>>, vector<1x1x4xf32>
    %22 = vector.shape_cast %21 : vector<1x1x4xf32> to vector<1x4xf32>
    %23 = vector.broadcast %22 : vector<1x4xf32> to vector<256x4xf32>
    %24 = arith.addf %20, %23 : vector<256x4xf32>
    %c0_19 = arith.constant 0 : index
    %c0_20 = arith.constant 0 : index
    %25 = vector.load %arg3[%c0_19, %c0_20] : memref<256x4xf32, #tpu.memory_space<vmem>>, vector<256x4xf32>
    tpu.vector_store %arg3[%c0_19, %c0_20], %24 {strides = array<i32>} : memref<256x4xf32, #tpu.memory_space<vmem>>, vector<256x4xf32>,
    return
  }
  func.func @transform_0(%arg0: i32) -> (i32, i32) {
    %c0_i32 = arith.constant 0 : i32
    %c0_i32_0 = arith.constant 0 : i32
    return %arg0, %c0_i32 : i32, i32
  }
  func.func @transform_1(%arg0: i32) -> (i32, i32, i32) {
    %c0_i32 = arith.constant 0 : i32
    %c0_i32_0 = arith.constant 0 : i32
    %c0_i32_1 = arith.constant 0 : i32
    %c0_i32_2 = arith.constant 0 : i32
    return %c0_i32, %c0_i32_0, %c0_i32_1 : i32, i32, i32
  }
  func.func @transform_2(%arg0: i32) -> (i32, i32) {
    %c0_i32 = arith.constant 0 : i32
    %c0_i32_0 = arith.constant 0 : i32
    return %arg0, %c0_i32 : i32, i32
  }
}

</mosaic_0001>

<bundles_post_ra>
// kernel: dqn_forward.1
= control target key start
LH: loop header
LB: loop body
LE: loop exit
PB: predicated region body
PF: predicated region fallthrough
CT: control target
= control target key end

     0   :  { %s1025_s9 = smov 0   ;;  %s1400_s0 = inlined_call_operand.vmem [shape: f32[512,32], index: 0, kind: input, shape index: {}]   ;;  %s1401_s1 = inlined_call_operand.vmem [shape: f32[4,128,128], index: 1, kind: input, shape index: {}]   ;;  %s1402_s2 = inlined_call_operand.vmem [shape: f32[512,4], index: 2, kind: output, shape index: {}]  }
   0x1 LB: > { %s813_s10 = sadd.s32 4294967295, %s1008_s9   ;;  %p817_p0 = scmp.ge.s32.totalorder %s1008_s9, 1  ;;  %s1008_s9 = sphi %s1025_s9, %s12_s9  }
   0x2   : > { %p113_p1 = scmp.lt.s32.totalorder %s1008_s9, 3 }
   0x4   : > { %p114_p2 = pnand %p817_p0, %p113_p1 }
   0x5   : > { %s818_s15 = sshll.u32 (!%p114_p2), %s813_s10, 5 }
   0x6   : > { %117 = sbr.rel (%p114_p2) target bundleno = 673 (0x2a1), region = 28  ;;  %p136_p3 = scmp.lt.s32.totalorder (!%p114_p2), %s818_s15, 63 }
   0xb   : > { %v182_v0 = vld [vmem:[%s1401_s1 + $0x18] sm:$0xff]  ;;  %v181_v1 = vld [vmem:[%s1401_s1 + $0x10] sm:$0xff]  ;;  %v180_v2 = vld [vmem:[%s1401_s1 + $0x8] sm:$0xff]  ;;  %s1404_s15 = smov (!%p136_p3, %s818_s15), 63  ;;  %vm186_vm0 = vcmask 261120   ;;  %vm724_vm1 = vcmask 31744  }
   0xc   : > { %295 = vmatpush.msra.mxu0 %v182_v0  ;;  %891 = vmatpush.msra.mxu3 %v182_v0  ;;  %v179_v3 = vld [vmem:[%s1401_s1] sm:$0xff]  ;;  %s819_s20 = sshll.u32 %s1404_s15, 3  ;;  %v870_v14 = vld [vmem:[%s1401_s1 + $0xf8] sm:$0xff]  ;;  %v869_v15 = vld [vmem:[%s1401_s1 + $0xf0] sm:$0xff] }
   0xd   : > { %s1053_s23 = scalar_lea.vmem %s1400_s0, %s819_s20  ;;  %447 = vmatpush.msra.mxu1 %v870_v14  ;;  %v868_v16 = vld [vmem:[%s1401_s1 + $0xe8] sm:$0xff]  ;;  %v867_v17 = vld [vmem:[%s1401_s1 + $0xe0] sm:$0xff]  ;;  %v866_v19 = vld [vmem:[%s1401_s1 + $0xd8] sm:$0xff]  ;;  %s1284_s22 = scalar_lea.vmem %s1402_s2, %s819_s20 }
   0xe   : > { %296 = vmatpush.msra.mxu0 %v181_v1  ;;  %892 = vmatpush.msra.mxu3 %v181_v1  ;;  %v147_v4 = vld [vmem:[%s1053_s23] sm:$0xff]  ;;  %v148_v5 = vld [vmem:[%s1053_s23 + $0x8] sm:$0xff]  ;;  %v149_v6 = vld [vmem:[%s1053_s23 + $0x10] sm:$0xff] }
   0xf   : > { %v150_v7 = vld [vmem:[%s1053_s23 + $0x18] sm:$0xff]  ;;  %v151_v8 = vld [vmem:[%s1053_s23 + $0x20] sm:$0xff]  ;;  %v152_v9 = vld [vmem:[%s1053_s23 + $0x28] sm:$0xff]  ;;  %448 = vmatpush.msra.mxu1 %v869_v15 }
  0x10   : > { %297 = vmatpush.msra.mxu0 %v180_v2  ;;  %893 = vmatpush.msra.mxu3 %v180_v2  ;;  %v153_v10 = vld [vmem:[%s1053_s23 + $0x30] sm:$0xff]  ;;  %v154_v11 = vld [vmem:[%s1053_s23 + $0x38] sm:$0xff]  ;;  %v155_v12 = vld [vmem:[%s1053_s23 + $0x40] sm:$0xff] }
  0x11   : > { %v156_v13 = vld [vmem:[%s1053_s23 + $0x48] sm:$0xff]  ;;  %449 = vmatpush.msra.mxu1 %v868_v16  ;;  %v157_v18 = vld [vmem:[%s1053_s23 + $0x50] sm:$0xff]  ;;  %v863_v22 = vld [vmem:[%s1401_s1 + $0xc0] sm:$0xff] }
  0x12   : > { %298 = vmatpush.msra.mxu0 %v179_v3  ;;  %894 = vmatpush.msra.mxu3 %v179_v3  ;;  %v865_v20 = vld [vmem:[%s1401_s1 + $0xd0] sm:$0xff]  ;;  %v864_v21 = vld [vmem:[%s1401_s1 + $0xc8] sm:$0xff]  ;;  %v158_v23 = vld [vmem:[%s1053_s23 + $0x58] sm:$0xff] }
  0x13   : > { %823 = vmatmul.msk.f32.vlgmr.msra.gmra.mxu0 %vm186_vm0, %v147_v4  ;;  %450 = vmatpush.msra.mxu1 %v867_v17  ;;  %v862_v24 = vld [vmem:[%s1401_s1 + $0xb8] sm:$0xff]  ;;  %v861_v25 = vld [vmem:[%s1401_s1 + $0xb0] sm:$0xff]  ;;  %v860_v26 = vld [vmem:[%s1401_s1 + $0xa8] sm:$0xff] }
  0x14   : > { %895 = vmatpush.msrb.mxu3 %v870_v14  ;;  %v159_v27 = vld [vmem:[%s1053_s23 + $0x60] sm:$0xff]  ;;  %v858_v29 = vld [vmem:[%s1401_s1 + $0x98] sm:$0xff]  ;;  %v857_v30 = vld [vmem:[%s1401_s1 + $0x90] sm:$0xff] }
  0x15   : > { %451 = vmatpush.msra.mxu1 %v866_v19  ;;  %v859_v28 = vld [vmem:[%s1401_s1 + $0xa0] sm:$0xff]  ;;  %v856_v31 = vld [vmem:[%s1401_s1 + $0x88] sm:$0xff]  ;;  %v161_v34 = vld [vmem:[%s1053_s23 + $0x70] sm:$0xff] }
  0x16   : > { %896 = vmatpush.msrb.mxu3 %v869_v15  ;;  %v160_v32 = vld [vmem:[%s1053_s23 + $0x68] sm:$0xff]  ;;  %v855_v33 = vld [vmem:[%s1401_s1 + $0x80] sm:$0xff]  ;;  %v162_v35 = vld [vmem:[%s1053_s23 + $0x78] sm:$0xff] }
  0x17   : > { %452 = vmatpush.msra.mxu1 %v865_v20  ;;  %v1138_v36 = vld [vmem:[%s1401_s1 + $0x180] ss:$0 sm:$0xff]  ;;  %v164_v41 = vld [vmem:[%s1053_s23 + $0x88] sm:$0xff]  ;;  %v165_v45 = vld [vmem:[%s1053_s23 + $0x90] sm:$0xff] }
  0x18   : > { %897 = vmatpush.msrb.mxu3 %v868_v16  ;;  %v163_v38 = vld [vmem:[%s1053_s23 + $0x80] sm:$0xff]  ;;  %v166_v49 = vld [vmem:[%s1053_s23 + $0x98] sm:$0xff]  ;;  %v168_v57 = vld [vmem:[%s1053_s23 + $0xa8] sm:$0xff] }
  0x19   : > { %453 = vmatpush.msra.mxu1 %v864_v21  ;;  %v167_v53 = vld [vmem:[%s1053_s23 + $0xa0] sm:$0xff]  ;;  %v173_v60 = vld [vmem:[%s1053_s23 + $0xd0] sm:$0xff]  ;;  %v174_v1 = vld [vmem:[%s1053_s23 + $0xd8] sm:$0xff] }
  0x1a   : > { %898 = vmatpush.msrb.mxu3 %v867_v17  ;;  %v169_v62 = vld [vmem:[%s1053_s23 + $0xb0] sm:$0xff]  ;;  %v170_v3 = vld [vmem:[%s1053_s23 + $0xb8] sm:$0xff] }
  0x1b   : > { %824 = vmatmul.msk.f32.gmra.mxu0 %vm186_vm0, %v148_v5  ;;  %454 = vmatpush.msra.mxu1 %v863_v22  ;;  %v177_v16 = vld [vmem:[%s1053_s23 + $0xf0] sm:$0xff]  ;;  %v887_v17 = vld [vmem:[%s1401_s1 + $0x178] sm:$0xff] }
  0x1c   : > { %899 = vmatpush.msrb.mxu3 %v866_v19  ;;  %611 = vmatpush.msra.mxu2 %v887_v17 }
  0x1d   : > { %455 = vmatpush.msra.mxu1 %v862_v24  ;;  %849 = vmatmul.msk.f32.vlgmr.msra.gmra.mxu3 %vm186_vm0, %v173_v60 }
  0x1e   : > { %900 = vmatpush.msrb.mxu3 %v865_v20  ;;  %v885_v20 = vld [vmem:[%s1401_s1 + $0x168] sm:$0xff] }
  0x1f   : > { %456 = vmatpush.msra.mxu1 %v861_v25 }
  0x20   : > { %901 = vmatpush.msrb.mxu3 %v864_v21 }
  0x21   : > { %457 = vmatpush.msra.mxu1 %v860_v26 }
  0x22   : > { %902 = vmatpush.msrb.mxu3 %v863_v22 }
  0x23   : > { %825 = vmatmul.msk.f32.gmra.mxu0 %vm186_vm0, %v149_v6  ;;  %458 = vmatpush.msra.mxu1 %v859_v28  ;;  %v175_v6 = vld [vmem:[%s1053_s23 + $0xe0] sm:$0xff] }
  0x24   : > { %903 = vmatpush.msrb.mxu3 %v862_v24  ;;  %v178_v24 = vld [vmem:[%s1053_s23 + $0xf8] sm:$0xff] }
  0x25   : > { %459 = vmatpush.msra.mxu1 %v858_v29  ;;  %850 = vmatmul.msk.f32.gmra.mxu3 %vm186_vm0, %v174_v1 }
  0x26   : > { %904 = vmatpush.msrb.mxu3 %v861_v25  ;;  %v883_v25 = vld [vmem:[%s1401_s1 + $0x158] sm:$0xff] }
  0x27   : > { %460 = vmatpush.msra.mxu1 %v857_v30 }
  0x28   : > { %905 = vmatpush.msrb.mxu3 %v860_v26  ;;  %v882_v26 = vld [vmem:[%s1401_s1 + $0x150] sm:$0xff] }
  0x29   : > { %461 = vmatpush.msra.mxu1 %v856_v31 }
  0x2a   : > { %906 = vmatpush.msrb.mxu3 %v859_v28  ;;  %v881_v28 = vld [vmem:[%s1401_s1 + $0x148] sm:$0xff] }
  0x2b   : > { %826 = vmatmul.msk.f32.gmra.mxu0 %vm186_vm0, %v150_v7  ;;  %462 = vmatpush.msra.mxu1 %v855_v33 }
  0x2c   : > { %907 = vmatpush.msrb.mxu3 %v858_v29 }
  0x2d   : > { %851 = vmatmul.msk.f32.gmra.mxu3 %vm186_vm0, %v175_v6 }
  0x2e   : > { %908 = vmatpush.msrb.mxu3 %v857_v30 }
  0x30   : > { %909 = vmatpush.msrb.mxu3 %v856_v31  ;;  %v880_v31 = vld [vmem:[%s1401_s1 + $0x140] sm:$0xff] }
  0x32   : > { %910 = vmatpush.msrb.mxu3 %v855_v33  ;;  %v878_v33 = vld [vmem:[%s1401_s1 + $0x130] sm:$0xff] }
  0x33   : > { %827 = vmatmul.msk.f32.gmra.mxu0 %vm186_vm0, %v151_v8  ;;  %v171_v8 = vld [vmem:[%s1053_s23 + $0xc0] sm:$0xff] }
  0x34   : > { %911 = vmatpush.msra.mxu3 %v887_v17 }
  0x3b   : > { %828 = vmatmul.msk.f32.gmra.mxu0 %vm186_vm0, %v152_v9 }
  0x43   : > { %829 = vmatmul.msk.f32.gmra.mxu0 %vm186_vm0, %v153_v10 }
  0x4b   : > { %830 = vmatmul.msk.f32.gmra.mxu0 %vm186_vm0, %v154_v11  ;;  %v176_v11 = vld [vmem:[%s1053_s23 + $0xe8] sm:$0xff] }
  0x4c   : > { %852 = vmatmul.msk.f32.gmra.mxu3 %vm186_vm0, %v176_v11 }
  0x53   : > { %831 = vmatmul.msk.f32.gmra.mxu0 %vm186_vm0, %v155_v12 }
  0x54   : > { %853 = vmatmul.msk.f32.gmra.mxu3 %vm186_vm0, %v177_v16 }
  0x5b   : > { %832 = vmatmul.msk.f32.gmra.mxu0 %vm186_vm0, %v156_v13  ;;  %v172_v13 = vld [vmem:[%s1053_s23 + $0xc8] sm:$0xff] }
  0x5c   : > { %854 = vmatmul.msk.f32.gmra.mxu3 %vm186_vm0, %v178_v24 }
  0x63   : > { %833 = vmatmul.msk.f32.gmra.mxu0 %vm186_vm0, %v157_v18  ;;  %v886_v18 = vld [vmem:[%s1401_s1 + $0x170] sm:$0xff] }
  0x64   : > { %612 = vmatpush.msra.mxu2 %v886_v18  ;;  %912 = vmatpush.msra.mxu3 %v886_v18 }
  0x66   : > { %613 = vmatpush.msra.mxu2 %v885_v20  ;;  %913 = vmatpush.msra.mxu3 %v885_v20 }
  0x6b   : > { %834 = vmatmul.msk.f32.gmra.mxu0 %vm186_vm0, %v158_v23  ;;  %v884_v23 = vld [vmem:[%s1401_s1 + $0x160] sm:$0xff] }
  0x6c   : > { %614 = vmatpush.msra.mxu2 %v884_v23  ;;  %914 = vmatpush.msra.mxu3 %v884_v23 }
  0x6e   : > { %615 = vmatpush.msra.mxu2 %v883_v25  ;;  %915 = vmatpush.msra.mxu3 %v883_v25 }
  0x70   : > { %616 = vmatpush.msra.mxu2 %v882_v26  ;;  %916 = vmatpush.msra.mxu3 %v882_v26 }
  0x72   : > { %617 = vmatpush.msra.mxu2 %v881_v28  ;;  %917 = vmatpush.msra.mxu3 %v881_v28 }
  0x73   : > { %835 = vmatmul.msk.f32.gmra.mxu0 %vm186_vm0, %v159_v27 }
  0x74   : > { %618 = vmatpush.msra.mxu2 %v880_v31  ;;  %918 = vmatpush.msra.mxu3 %v880_v31 }
  0x7b   : > { %836 = vmatmul.msk.f32.gmra.mxu0 %vm186_vm0, %v160_v32  ;;  %v879_v32 = vld [vmem:[%s1401_s1 + $0x138] sm:$0xff] }
  0x7c   : > { %619 = vmatpush.msra.mxu2 %v879_v32  ;;  %919 = vmatpush.msra.mxu3 %v879_v32 }
  0x7e   : > { %620 = vmatpush.msra.mxu2 %v878_v33  ;;  %920 = vmatpush.msra.mxu3 %v878_v33 }
  0x83   : > { %837 = vmatmul.msk.f32.gmra.mxu0 %vm186_vm0, %v161_v34 }
  0x8b   : > { %838 = vmatmul.msk.f32.gmra.mxu0 %vm186_vm0, %v162_v35  ;;  %v877_v35 = vld [vmem:[%s1401_s1 + $0x128] sm:$0xff] }
  0x8c   : > { %621 = vmatpush.msra.mxu2 %v877_v35  ;;  %921 = vmatpush.msra.mxu3 %v877_v35 }
  0x90   : > { %v300_v37 = vpop.f32.mrf.mxu0 }
  0x91   : > { %v301_v39 = vadd.f32 %v1138_v36, %v300_v37 }
  0x93   : > { %938 = vtanh.f32 %v301_v39  ;;  %839 = vmatmul.msk.f32.gmra.mxu0 %vm186_vm0, %v163_v38  ;;  %v876_v39 = vld [vmem:[%s1401_s1 + $0x120] sm:$0xff] }
  0x94   : > { %622 = vmatpush.msra.mxu2 %v876_v39  ;;  %922 = vmatpush.msra.mxu3 %v876_v39 }
  0x98   : > { %v303_v40 = vpop.f32.mrf.mxu0 }
  0x99   : > { %v939_v42 = vpop.eup %938  ;;  %v304_v43 = vadd.f32 %v1138_v36, %v303_v40  ;;  %v875_v40 = vld [vmem:[%s1401_s1 + $0x118] sm:$0xff] }
  0x9a   : > { %463 = vmatmul.f32.vlgmr.msra.gmra.mxu1 %v939_v42  ;;  %623 = vmatpush.msra.mxu2 %v875_v40 }
  0x9b   : > { %940 = vtanh.f32 %v304_v43  ;;  %840 = vmatmul.msk.f32.gmra.mxu0 %vm186_vm0, %v164_v41  ;;  %923 = vmatpush.msra.mxu3 %v875_v40  ;;  %v874_v41 = vld [vmem:[%s1401_s1 + $0x110] sm:$0xff]  ;;  %v873_v43 = vld [vmem:[%s1401_s1 + $0x108] sm:$0xff] }
  0x9c   : > { %624 = vmatpush.msra.mxu2 %v874_v41 }
  0x9d   : > { %924 = vmatpush.msra.mxu3 %v874_v41 }
  0x9e   : > { %625 = vmatpush.msra.mxu2 %v873_v43 }
  0x9f   : > { %925 = vmatpush.msra.mxu3 %v873_v43 }
  0xa0   : > { %v306_v44 = vpop.f32.mrf.mxu0  ;;  %v378_v39 = vpop.f32.mrf.mxu3 }
  0xa1   : > { %v941_v46 = vpop.eup %940  ;;  %v307_v47 = vadd.f32 %v1138_v36, %v306_v44 }
  0xa2   : > { %466 = vmatmul.f32.gmra.mxu1 %v941_v46  ;;  %v872_v46 = vld [vmem:[%s1401_s1 + $0x100] sm:$0xff] }
  0xa3   : > { %942 = vtanh.f32 %v307_v47  ;;  %841 = vmatmul.msk.f32.gmra.mxu0 %vm186_vm0, %v165_v45  ;;  %626 = vmatpush.msra.mxu2 %v872_v46 }
  0xa4   : > { %926 = vmatpush.msra.mxu3 %v872_v46 }
  0xa8   : > { %v309_v48 = vpop.f32.mrf.mxu0 }
  0xa9   : > { %v943_v50 = vpop.eup %942  ;;  %v310_v51 = vadd.f32 %v1138_v36, %v309_v48 }
  0xaa   : > { %469 = vmatmul.f32.gmra.mxu1 %v943_v50 }
  0xab   : > { %944 = vtanh.f32 %v310_v51  ;;  %842 = vmatmul.msk.f32.gmra.mxu0 %vm186_vm0, %v166_v49 }
  0xb0   : > { %v312_v52 = vpop.f32.mrf.mxu0 }
  0xb1   : > { %v945_v54 = vpop.eup %944  ;;  %v313_v55 = vadd.f32 %v1138_v36, %v312_v52 }
  0xb2   : > { %472 = vmatmul.f32.gmra.mxu1 %v945_v54 }
  0xb3   : > { %946 = vtanh.f32 %v313_v55  ;;  %843 = vmatmul.msk.f32.gmra.mxu0 %vm186_vm0, %v167_v53 }
  0xb8   : > { %v315_v56 = vpop.f32.mrf.mxu0 }
  0xb9   : > { %v947_v58 = vpop.eup %946  ;;  %v316_v59 = vadd.f32 %v1138_v36, %v315_v56  ;;  %v1240_v56 = vld [vmem:[%s1401_s1 + $0x181] ss:$0 sm:$0xff] }
  0xba   : > { %475 = vmatmul.f32.gmra.mxu1 %v947_v58 }
  0xbb   : > { %948 = vtanh.f32 %v316_v59  ;;  %844 = vmatmul.msk.f32.gmra.mxu0 %vm186_vm0, %v168_v57 }
  0xc0   : > { %v318_v61 = vpop.f32.mrf.mxu0 }
  0xc1   : > { %v949_v63 = vpop.eup %948  ;;  %v319_v0 = vadd.f32 %v1138_v36, %v318_v61 }
  0xc2   : > { %478 = vmatmul.f32.gmra.mxu1 %v949_v63 }
  0xc3   : > { %950 = vtanh.f32 %v319_v0  ;;  %845 = vmatmul.msk.f32.gmra.mxu0 %vm186_vm0, %v169_v62 }
  0xc8   : > { %v321_v2 = vpop.f32.mrf.mxu0 }
  0xc9   : > { %v951_v4 = vpop.eup %950  ;;  %v322_v5 = vadd.f32 %v1138_v36, %v321_v2 }
  0xca   : > { %481 = vmatmul.f32.gmra.mxu1 %v951_v4 }
  0xcb   : > { %952 = vtanh.f32 %v322_v5  ;;  %846 = vmatmul.msk.f32.gmra.mxu0 %vm186_vm0, %v170_v3 }
  0xd0   : > { %v324_v7 = vpop.f32.mrf.mxu0 }
  0xd1   : > { %v953_v9 = vpop.eup %952  ;;  %v325_v10 = vadd.f32 %v1138_v36, %v324_v7 }
  0xd2   : > { %484 = vmatmul.f32.gmra.mxu1 %v953_v9 }
  0xd3   : > { %954 = vtanh.f32 %v325_v10  ;;  %847 = vmatmul.msk.f32.gmra.mxu0 %vm186_vm0, %v171_v8 }
  0xd8   : > { %v327_v12 = vpop.f32.mrf.mxu0 }
  0xd9   : > { %v955_v14 = vpop.eup %954  ;;  %v328_v15 = vadd.f32 %v1138_v36, %v327_v12 }
  0xda   : > { %487 = vmatmul.f32.gmra.mxu1 %v955_v14 }
  0xdb   : > { %956 = vtanh.f32 %v328_v15  ;;  %848 = vmatmul.msk.f32.gmra.mxu0 %vm186_vm0, %v172_v13 }
  0xe0   : > { %v330_v19 = vpop.f32.mrf.mxu0 }
  0xe1   : > { %v957_v21 = vpop.eup %956  ;;  %v331_v22 = vadd.f32 %v1138_v36, %v330_v19 }
  0xe2   : > { %490 = vmatmul.f32.gmra.mxu1 %v957_v21 }
  0xe3   : > { %958 = vtanh.f32 %v331_v22 }
  0xe8   : > { %v333_v27 = vpop.f32.mrf.mxu0 }
  0xe9   : > { %v959_v29 = vpop.eup %958  ;;  %v334_v30 = vadd.f32 %v1138_v36, %v333_v27 }
  0xea   : > { %493 = vmatmul.f32.gmra.mxu1 %v959_v29 }
  0xeb   : > { %960 = vtanh.f32 %v334_v30 }
  0xf0   : > { %v336_v34 = vpop.f32.mrf.mxu0 }
  0xf1   : > { %v961_v37 = vpop.eup %960  ;;  %v337_v38 = vadd.f32 %v1138_v36, %v336_v34 }
  0xf2   : > { %496 = vmatmul.f32.gmra.mxu1 %v961_v37 }
  0xf3   : > { %962 = vtanh.f32 %v337_v38 }
  0xf8   : > { %v339_v42 = vpop.f32.mrf.mxu0 }
  0xf9   : > { %v963_v44 = vpop.eup %962  ;;  %v340_v45 = vadd.f32 %v1138_v36, %v339_v42 }
  0xfa   : > { %499 = vmatmul.f32.gmra.mxu1 %v963_v44 }
  0xfb   : > { %964 = vtanh.f32 %v340_v45 }
 0x100   : > { %v342_v47 = vpop.f32.mrf.mxu0 }
 0x101   : > { %v965_v48 = vpop.eup %964  ;;  %v343_v49 = vadd.f32 %v1138_v36, %v342_v47 }
 0x102   : > { %502 = vmatmul.f32.gmra.mxu1 %v965_v48 }
 0x103   : > { %966 = vtanh.f32 %v343_v49  ;;  %v381_v49 = vpop.f32.mrf.mxu3 }
 0x108   : > { %v345_v50 = vpop.f32.mrf.mxu0 }
 0x109   : > { %v967_v51 = vpop.eup %966  ;;  %v346_v52 = vadd.f32 %v1138_v36, %v345_v50  ;;  %v379_v50 = vadd.f32 %v1138_v36, %v378_v39 }
 0x10a   : > { %505 = vmatmul.f32.gmra.mxu1 %v967_v51 }
 0x10b   : > { %968 = vtanh.f32 %v346_v52 }
 0x110   : > { %v348_v53 = vpop.f32.mrf.mxu0 }
 0x111   : > { %v969_v54 = vpop.eup %968  ;;  %v349_v55 = vadd.f32 %v1138_v36, %v348_v53 }
 0x112   : > { %508 = vmatmul.f32.gmra.mxu1 %v969_v54 }
 0x113   : > { %970 = vtanh.f32 %v349_v55  ;;  %v384_v55 = vpop.f32.mrf.mxu3 }
 0x117   : > { %v464_v57 = vpop.f32.mrf.mxu1 }
 0x118   : > { %v465_v58 = vadd.f32 %v1240_v56, %v464_v57  ;;  %v351_v59 = vpop.f32.mrf.mxu0  ;;  %v382_v57 = vadd.f32 %v1138_v36, %v381_v49 }
 0x119   : > { %v971_v60 = vpop.eup %970  ;;  %v352_v61 = vadd.f32 %v1138_v36, %v351_v59 }
 0x11a   : > { %v560_v62 = vmax.f32 %v465_v58, 0.0  ;;  %511 = vmatmul.f32.gmra.mxu1 %v971_v60 }
 0x11b   : > { %972 = vtanh.f32 %v352_v61 }
 0x11c   : > { %627 = vmatmul.f32.vlgmr.msra.gmra.mxu2 %v560_v62  ;;  %v385_v62 = vadd.f32 %v1138_v36, %v384_v55 }
 0x11f   : > { %v467_v63 = vpop.f32.mrf.mxu1 }
 0x120   : > { %v468_v0 = vadd.f32 %v1240_v56, %v467_v63  ;;  %v354_v1 = vpop.f32.mrf.mxu0  ;;  %v387_v63 = vpop.f32.mrf.mxu3 }
 0x121   : > { %v973_v2 = vpop.eup %972  ;;  %v355_v3 = vadd.f32 %v1138_v36, %v354_v1 }
 0x122   : > { %v561_v4 = vmax.f32 %v468_v0, 0.0  ;;  %514 = vmatmul.f32.gmra.mxu1 %v973_v2 }
 0x123   : > { %974 = vtanh.f32 %v355_v3 }
 0x124   : > { %630 = vmatmul.f32.gmra.mxu2 %v561_v4  ;;  %v388_v4 = vadd.f32 %v1138_v36, %v387_v63 }
 0x127   : > { %v470_v5 = vpop.f32.mrf.mxu1 }
 0x128   : > { %v471_v6 = vadd.f32 %v1240_v56, %v470_v5  ;;  %v357_v7 = vpop.f32.mrf.mxu0 }
 0x129   : > { %v975_v8 = vpop.eup %974  ;;  %v358_v9 = vadd.f32 %v1138_v36, %v357_v7 }
 0x12a   : > { %v562_v10 = vmax.f32 %v471_v6, 0.0  ;;  %517 = vmatmul.f32.gmra.mxu1 %v975_v8  ;;  %v390_v8 = vpop.f32.mrf.mxu3 }
 0x12b   : > { %976 = vtanh.f32 %v358_v9 }
 0x12c   : > { %633 = vmatmul.f32.gmra.mxu2 %v562_v10  ;;  %v391_v10 = vadd.f32 %v1138_v36, %v390_v8 }
 0x12f   : > { %v473_v11 = vpop.f32.mrf.mxu1 }
 0x130   : > { %v474_v12 = vadd.f32 %v1240_v56, %v473_v11  ;;  %v360_v13 = vpop.f32.mrf.mxu0 }
 0x131   : > { %v977_v14 = vpop.eup %976  ;;  %v361_v15 = vadd.f32 %v1138_v36, %v360_v13 }
 0x132   : > { %v563_v16 = vmax.f32 %v474_v12, 0.0  ;;  %520 = vmatmul.f32.gmra.mxu1 %v977_v14 }
 0x133   : > { %978 = vtanh.f32 %v361_v15  ;;  %v393_v15 = vpop.f32.mrf.mxu3 }
 0x134   : > { %636 = vmatmul.f32.gmra.mxu2 %v563_v16  ;;  %v394_v16 = vadd.f32 %v1138_v36, %v393_v15 }
 0x137   : > { %v476_v17 = vpop.f32.mrf.mxu1 }
 0x138   : > { %v477_v18 = vadd.f32 %v1240_v56, %v476_v17  ;;  %v363_v19 = vpop.f32.mrf.mxu0 }
 0x139   : > { %v979_v20 = vpop.eup %978  ;;  %v364_v21 = vadd.f32 %v1138_v36, %v363_v19 }
 0x13a   : > { %v564_v22 = vmax.f32 %v477_v18, 0.0  ;;  %523 = vmatmul.f32.gmra.mxu1 %v979_v20 }
 0x13b   : > { %980 = vtanh.f32 %v364_v21 }
 0x13c   : > { %639 = vmatmul.f32.gmra.mxu2 %v564_v22 }
 0x13f   : > { %v479_v23 = vpop.f32.mrf.mxu1 }
 0x140   : > { %v480_v24 = vadd.f32 %v1240_v56, %v479_v23  ;;  %v366_v25 = vpop.f32.mrf.mxu0 }
 0x141   : > { %v981_v26 = vpop.eup %980  ;;  %v367_v27 = vadd.f32 %v1138_v36, %v366_v25 }
 0x142   : > { %v565_v28 = vmax.f32 %v480_v24, 0.0  ;;  %526 = vmatmul.f32.gmra.mxu1 %v981_v26 }
 0x143   : > { %982 = vtanh.f32 %v367_v27  ;;  %v1277_v27 = vld [vmem:[%s1401_s1 + $0x182] ss:$0 sm:$0xff] }
 0x144   : > { %642 = vmatmul.f32.gmra.mxu2 %v565_v28 }
 0x147   : > { %v482_v29 = vpop.f32.mrf.mxu1 }
 0x148   : > { %v483_v30 = vadd.f32 %v1240_v56, %v482_v29  ;;  %v369_v31 = vpop.f32.mrf.mxu0 }
 0x149   : > { %v983_v32 = vpop.eup %982  ;;  %v370_v33 = vadd.f32 %v1138_v36, %v369_v31 }
 0x14a   : > { %v566_v34 = vmax.f32 %v483_v30, 0.0  ;;  %529 = vmatmul.f32.gmra.mxu1 %v983_v32 }
 0x14b   : > { %984 = vtanh.f32 %v370_v33 }
 0x14c   : > { %645 = vmatmul.f32.gmra.mxu2 %v566_v34 }
 0x14f   : > { %v485_v35 = vpop.f32.mrf.mxu1 }
 0x150   : > { %v486_v37 = vadd.f32 %v1240_v56, %v485_v35  ;;  %v372_v38 = vpop.f32.mrf.mxu0 }
 0x151   : > { %v985_v40 = vpop.eup %984  ;;  %v373_v41 = vadd.f32 %v1138_v36, %v372_v38 }
 0x152   : > { %v567_v42 = vmax.f32 %v486_v37, 0.0  ;;  %532 = vmatmul.f32.gmra.mxu1 %v985_v40 }
 0x153   : > { %986 = vtanh.f32 %v373_v41 }
 0x154   : > { %648 = vmatmul.f32.gmra.mxu2 %v567_v42 }
 0x157   : > { %v488_v43 = vpop.f32.mrf.mxu1 }
 0x158   : > { %v489_v44 = vadd.f32 %v1240_v56, %v488_v43  ;;  %v375_v45 = vpop.f32.mrf.mxu0 }
 0x159   : > { %v987_v46 = vpop.eup %986  ;;  %v376_v47 = vadd.f32 %v1138_v36, %v375_v45 }
 0x15a   : > { %v568_v48 = vmax.f32 %v489_v44, 0.0  ;;  %535 = vmatmul.f32.vlgmr.msrb.gmra.mxu3 %v987_v46 }
 0x15b   : > { %988 = vtanh.f32 %v376_v47 }
 0x15c   : > { %651 = vmatmul.f32.gmra.mxu2 %v568_v48  ;;  %990 = vtanh.f32 %v379_v50 }
 0x15d   : > { %992 = vtanh.f32 %v382_v57 }
 0x15e   : > { %994 = vtanh.f32 %v385_v62 }
 0x15f   : > { %v491_v51 = vpop.f32.mrf.mxu1  ;;  %996 = vtanh.f32 %v388_v4 }
 0x160   : > { %v492_v52 = vadd.f32 %v1240_v56, %v491_v51  ;;  %998 = vtanh.f32 %v391_v10 }
 0x161   : > { %v989_v53 = vpop.eup %988  ;;  %1000 = vtanh.f32 %v394_v16 }
 0x162   : > { %v569_v54 = vmax.f32 %v492_v52, 0.0  ;;  %538 = vmatmul.f32.gmra.mxu3 %v989_v53  ;;  %v991_v58 = vpop.eup %990 }
 0x163   : > { %v993_v0 = vpop.eup %992 }
 0x164   : > { %654 = vmatmul.f32.gmra.mxu2 %v569_v54  ;;  %v995_v5 = vpop.eup %994 }
 0x165   : > { %v997_v11 = vpop.eup %996 }
 0x166   : > { %v999_v17 = vpop.eup %998 }
 0x167   : > { %v494_v59 = vpop.f32.mrf.mxu1  ;;  %v1001_v21 = vpop.eup %1000 }
 0x168   : > { %v495_v60 = vadd.f32 %v1240_v56, %v494_v59 }
 0x16a   : > { %v570_v61 = vmax.f32 %v495_v60, 0.0  ;;  %541 = vmatmul.f32.gmra.mxu3 %v991_v58 }
 0x16c   : > { %657 = vmatmul.f32.gmra.mxu2 %v570_v61 }
 0x16f   : > { %v497_v1 = vpop.f32.mrf.mxu1 }
 0x170   : > { %v498_v2 = vadd.f32 %v1240_v56, %v497_v1 }
 0x172   : > { %v571_v3 = vmax.f32 %v498_v2, 0.0  ;;  %544 = vmatmul.f32.gmra.mxu3 %v993_v0 }
 0x174   : > { %660 = vmatmul.f32.gmra.mxu2 %v571_v3 }
 0x177   : > { %v500_v6 = vpop.f32.mrf.mxu1 }
 0x178   : > { %v501_v7 = vadd.f32 %v1240_v56, %v500_v6 }
 0x17a   : > { %v572_v9 = vmax.f32 %v501_v7, 0.0  ;;  %547 = vmatmul.f32.gmra.mxu3 %v995_v5 }
 0x17c   : > { %663 = vmatmul.f32.gmra.mxu2 %v572_v9 }
 0x17f   : > { %v503_v12 = vpop.f32.mrf.mxu1 }
 0x180   : > { %v504_v13 = vadd.f32 %v1240_v56, %v503_v12 }
 0x182   : > { %v573_v14 = vmax.f32 %v504_v13, 0.0  ;;  %550 = vmatmul.f32.gmra.mxu3 %v997_v11 }
 0x184   : > { %666 = vmatmul.f32.gmra.mxu2 %v573_v14 }
 0x187   : > { %v506_v18 = vpop.f32.mrf.mxu1 }
 0x188   : > { %v507_v19 = vadd.f32 %v1240_v56, %v506_v18 }
 0x18a   : > { %v574_v20 = vmax.f32 %v507_v19, 0.0  ;;  %553 = vmatmul.f32.gmra.mxu3 %v999_v17 }
 0x18c   : > { %669 = vmatmul.f32.gmra.mxu2 %v574_v20 }
 0x18f   : > { %v509_v22 = vpop.f32.mrf.mxu1 }
 0x190   : > { %v510_v23 = vadd.f32 %v1240_v56, %v509_v22 }
 0x192   : > { %v575_v24 = vmax.f32 %v510_v23, 0.0  ;;  %556 = vmatmul.f32.gmra.mxu3 %v1001_v21 }
 0x194   : > { %672 = vmatmul.f32.gmra.mxu2 %v575_v24 }
 0x197   : > { %v512_v25 = vpop.f32.mrf.mxu1 }
 0x198   : > { %v513_v26 = vadd.f32 %v1240_v56, %v512_v25 }
 0x19a   : > { %v576_v36 = vmax.f32 %v513_v26, 0.0 }
 0x19c   : > { %675 = vmatmul.f32.gmra.mxu2 %v576_v36 }
 0x19f   : > { %v515_v28 = vpop.f32.mrf.mxu1  ;;  %v628_v29 = vpop.f32.mrf.mxu2 }
 0x1a0   : > { %v516_v30 = vadd.f32 %v1240_v56, %v515_v28  ;;  %v629_v31 = vadd.f32 %v1277_v27, %v628_v29 }
 0x1a2   : > { %v577_v32 = vmax.f32 %v516_v30, 0.0  ;;  %725 = vst.msk [vmem:[%s1284_s22] sm:$0xff] %vm724_vm1, %v629_v31 }
 0x1a4   : > { %678 = vmatmul.f32.gmra.mxu2 %v577_v32 }
 0x1a7   : > { %v518_v33 = vpop.f32.mrf.mxu1  ;;  %v631_v34 = vpop.f32.mrf.mxu2 }
 0x1a8   : > { %v519_v35 = vadd.f32 %v1240_v56, %v518_v33  ;;  %v632_v37 = vadd.f32 %v1277_v27, %v631_v34 }
 0x1aa   : > { %v578_v38 = vmax.f32 %v519_v35, 0.0  ;;  %726 = vst.msk [vmem:[%s1284_s22 + $0x8] sm:$0xff] %vm724_vm1, %v632_v37 }
 0x1ac   : > { %681 = vmatmul.f32.gmra.mxu2 %v578_v38 }
 0x1af   : > { %v521_v39 = vpop.f32.mrf.mxu1  ;;  %v634_v40 = vpop.f32.mrf.mxu2 }
 0x1b0   : > { %v522_v41 = vadd.f32 %v1240_v56, %v521_v39  ;;  %v635_v42 = vadd.f32 %v1277_v27, %v634_v40 }
 0x1b2   : > { %v579_v43 = vmax.f32 %v522_v41, 0.0  ;;  %727 = vst.msk [vmem:[%s1284_s22 + $0x10] sm:$0xff] %vm724_vm1, %v635_v42 }
 0x1b4   : > { %684 = vmatmul.f32.gmra.mxu2 %v579_v43 }
 0x1b7   : > { %v524_v44 = vpop.f32.mrf.mxu1  ;;  %v637_v45 = vpop.f32.mrf.mxu2 }
 0x1b8   : > { %v525_v46 = vadd.f32 %v1240_v56, %v524_v44  ;;  %v638_v47 = vadd.f32 %v1277_v27, %v637_v45 }
 0x1ba   : > { %v580_v48 = vmax.f32 %v525_v46, 0.0  ;;  %728 = vst.msk [vmem:[%s1284_s22 + $0x18] sm:$0xff] %vm724_vm1, %v638_v47 }
 0x1bc   : > { %687 = vmatmul.f32.gmra.mxu2 %v580_v48 }
 0x1bf   : > { %v527_v49 = vpop.f32.mrf.mxu1  ;;  %v640_v50 = vpop.f32.mrf.mxu2 }
 0x1c0   : > { %v528_v51 = vadd.f32 %v1240_v56, %v527_v49  ;;  %v641_v52 = vadd.f32 %v1277_v27, %v640_v50 }
 0x1c2   : > { %v581_v53 = vmax.f32 %v528_v51, 0.0  ;;  %729 = vst.msk [vmem:[%s1284_s22 + $0x20] sm:$0xff] %vm724_vm1, %v641_v52 }
 0x1c4   : > { %690 = vmatmul.f32.gmra.mxu2 %v581_v53 }
 0x1c7   : > { %v530_v54 = vpop.f32.mrf.mxu1  ;;  %v643_v55 = vpop.f32.mrf.mxu2 }
 0x1c8   : > { %v531_v57 = vadd.f32 %v1240_v56, %v530_v54  ;;  %v644_v58 = vadd.f32 %v1277_v27, %v643_v55 }
 0x1ca   : > { %v582_v59 = vmax.f32 %v531_v57, 0.0  ;;  %730 = vst.msk [vmem:[%s1284_s22 + $0x28] sm:$0xff] %vm724_vm1, %v644_v58 }
 0x1cc   : > { %693 = vmatmul.f32.gmra.mxu2 %v582_v59 }
 0x1cf   : > { %v533_v60 = vpop.f32.mrf.mxu1  ;;  %v646_v61 = vpop.f32.mrf.mxu2 }
 0x1d0   : > { %v534_v62 = vadd.f32 %v1240_v56, %v533_v60  ;;  %v647_v63 = vadd.f32 %v1277_v27, %v646_v61 }
 0x1d2   : > { %v583_v0 = vmax.f32 %v534_v62, 0.0  ;;  %731 = vst.msk [vmem:[%s1284_s22 + $0x30] sm:$0xff] %vm724_vm1, %v647_v63 }
 0x1d4   : > { %696 = vmatmul.f32.gmra.mxu2 %v583_v0 }
 0x1d7   : > { %v649_v1 = vpop.f32.mrf.mxu2 }
 0x1d8   : > { %v650_v2 = vadd.f32 %v1277_v27, %v649_v1 }
 0x1da   : > { %732 = vst.msk [vmem:[%s1284_s22 + $0x38] sm:$0xff] %vm724_vm1, %v650_v2 }
 0x1dd   : > { %v536_v3 = vpop.f32.mrf.mxu3 }
 0x1de   : > { %v537_v4 = vadd.f32 %v1240_v56, %v536_v3 }
 0x1df   : > { %v652_v5 = vpop.f32.mrf.mxu2 }
 0x1e0   : > { %v584_v6 = vmax.f32 %v537_v4, 0.0  ;;  %v653_v7 = vadd.f32 %v1277_v27, %v652_v5 }
 0x1e2   : > { %733 = vst.msk [vmem:[%s1284_s22 + $0x40] sm:$0xff] %vm724_vm1, %v653_v7  ;;  %699 = vmatmul.f32.vlgmr.msra.gmra.mxu3 %v584_v6 }
 0x1e5   : > { %v539_v8 = vpop.f32.mrf.mxu3 }
 0x1e6   : > { %v540_v9 = vadd.f32 %v1240_v56, %v539_v8 }
 0x1e7   : > { %v655_v10 = vpop.f32.mrf.mxu2 }
 0x1e8   : > { %v585_v11 = vmax.f32 %v540_v9, 0.0  ;;  %v656_v12 = vadd.f32 %v1277_v27, %v655_v10 }
 0x1ea   : > { %734 = vst.msk [vmem:[%s1284_s22 + $0x48] sm:$0xff] %vm724_vm1, %v656_v12  ;;  %702 = vmatmul.f32.gmra.mxu3 %v585_v11 }
 0x1ed   : > { %v542_v13 = vpop.f32.mrf.mxu3 }
 0x1ee   : > { %v543_v14 = vadd.f32 %v1240_v56, %v542_v13 }
 0x1ef   : > { %v658_v15 = vpop.f32.mrf.mxu2 }
 0x1f0   : > { %v586_v16 = vmax.f32 %v543_v14, 0.0  ;;  %v659_v17 = vadd.f32 %v1277_v27, %v658_v15 }
 0x1f2   : > { %735 = vst.msk [vmem:[%s1284_s22 + $0x50] sm:$0xff] %vm724_vm1, %v659_v17  ;;  %705 = vmatmul.f32.gmra.mxu3 %v586_v16 }
 0x1f5   : > { %v545_v18 = vpop.f32.mrf.mxu3 }
 0x1f6   : > { %v546_v19 = vadd.f32 %v1240_v56, %v545_v18 }
 0x1f7   : > { %v661_v20 = vpop.f32.mrf.mxu2 }
 0x1f8   : > { %v587_v21 = vmax.f32 %v546_v19, 0.0  ;;  %v662_v22 = vadd.f32 %v1277_v27, %v661_v20 }
 0x1fa   : > { %736 = vst.msk [vmem:[%s1284_s22 + $0x58] sm:$0xff] %vm724_vm1, %v662_v22  ;;  %708 = vmatmul.f32.gmra.mxu3 %v587_v21 }
 0x1fd   : > { %v548_v23 = vpop.f32.mrf.mxu3 }
 0x1fe   : > { %v549_v24 = vadd.f32 %v1240_v56, %v548_v23 }
 0x1ff   : > { %v664_v25 = vpop.f32.mrf.mxu2 }
 0x200   : > { %v588_v26 = vmax.f32 %v549_v24, 0.0  ;;  %v665_v36 = vadd.f32 %v1277_v27, %v664_v25 }
 0x202   : > { %737 = vst.msk [vmem:[%s1284_s22 + $0x60] sm:$0xff] %vm724_vm1, %v665_v36  ;;  %711 = vmatmul.f32.gmra.mxu3 %v588_v26 }
 0x205   : > { %v551_v28 = vpop.f32.mrf.mxu3 }
 0x206   : > { %v552_v29 = vadd.f32 %v1240_v56, %v551_v28 }
 0x207   : > { %v667_v30 = vpop.f32.mrf.mxu2 }
 0x208   : > { %v589_v31 = vmax.f32 %v552_v29, 0.0  ;;  %v668_v32 = vadd.f32 %v1277_v27, %v667_v30 }
 0x20a   : > { %738 = vst.msk [vmem:[%s1284_s22 + $0x68] sm:$0xff] %vm724_vm1, %v668_v32  ;;  %714 = vmatmul.f32.gmra.mxu3 %v589_v31 }
 0x20d   : > { %v554_v33 = vpop.f32.mrf.mxu3 }
 0x20e   : > { %v555_v34 = vadd.f32 %v1240_v56, %v554_v33 }
 0x20f   : > { %v670_v35 = vpop.f32.mrf.mxu2 }
 0x210   : > { %v590_v37 = vmax.f32 %v555_v34, 0.0  ;;  %v671_v38 = vadd.f32 %v1277_v27, %v670_v35 }
 0x212   : > { %739 = vst.msk [vmem:[%s1284_s22 + $0x70] sm:$0xff] %vm724_vm1, %v671_v38  ;;  %717 = vmatmul.f32.gmra.mxu3 %v590_v37 }
 0x215   : > { %v557_v39 = vpop.f32.mrf.mxu3 }
 0x216   : > { %v558_v40 = vadd.f32 %v1240_v56, %v557_v39 }
 0x217   : > { %v673_v41 = vpop.f32.mrf.mxu2 }
 0x218   : > { %v591_v42 = vmax.f32 %v558_v40, 0.0  ;;  %v674_v43 = vadd.f32 %v1277_v27, %v673_v41 }
 0x21a   : > { %740 = vst.msk [vmem:[%s1284_s22 + $0x78] sm:$0xff] %vm724_vm1, %v674_v43  ;;  %720 = vmatmul.f32.gmra.mxu3 %v591_v42 }
 0x21f   : > { %v676_v44 = vpop.f32.mrf.mxu2 }
 0x220   : > { %v677_v45 = vadd.f32 %v1277_v27, %v676_v44 }
 0x222   : > { %741 = vst.msk [vmem:[%s1284_s22 + $0x80] sm:$0xff] %vm724_vm1, %v677_v45 }
 0x227   : > { %v679_v46 = vpop.f32.mrf.mxu2 }
 0x228   : > { %v680_v47 = vadd.f32 %v1277_v27, %v679_v46 }
 0x22a   : > { %742 = vst.msk [vmem:[%s1284_s22 + $0x88] sm:$0xff] %vm724_vm1, %v680_v47 }
 0x22f   : > { %v682_v56 = vpop.f32.mrf.mxu2 }
 0x230   : > { %v683_v48 = vadd.f32 %v1277_v27, %v682_v56 }
 0x232   : > { %743 = vst.msk [vmem:[%s1284_s22 + $0x90] sm:$0xff] %vm724_vm1, %v683_v48 }
 0x237   : > { %v685_v49 = vpop.f32.mrf.mxu2 }
 0x238   : > { %v686_v50 = vadd.f32 %v1277_v27, %v685_v49 }
 0x23a   : > { %744 = vst.msk [vmem:[%s1284_s22 + $0x98] sm:$0xff] %vm724_vm1, %v686_v50 }
 0x23f   : > { %v688_v51 = vpop.f32.mrf.mxu2 }
 0x240   : > { %v689_v52 = vadd.f32 %v1277_v27, %v688_v51 }
 0x242   : > { %745 = vst.msk [vmem:[%s1284_s22 + $0xa0] sm:$0xff] %vm724_vm1, %v689_v52 }
 0x247   : > { %v691_v53 = vpop.f32.mrf.mxu2 }
 0x248   : > { %v692_v54 = vadd.f32 %v1277_v27, %v691_v53 }
 0x24a   : > { %746 = vst.msk [vmem:[%s1284_s22 + $0xa8] sm:$0xff] %vm724_vm1, %v692_v54 }
 0x24f   : > { %v694_v55 = vpop.f32.mrf.mxu2 }
 0x250   : > { %v695_v57 = vadd.f32 %v1277_v27, %v694_v55 }
 0x252   : > { %747 = vst.msk [vmem:[%s1284_s22 + $0xb0] sm:$0xff] %vm724_vm1, %v695_v57 }
 0x257   : > { %v697_v58 = vpop.f32.mrf.mxu2 }
 0x258   : > { %v698_v59 = vadd.f32 %v1277_v27, %v697_v58 }
 0x25a   : > { %748 = vst.msk [vmem:[%s1284_s22 + $0xb8] sm:$0xff] %vm724_vm1, %v698_v59 }
 0x265   : > { %v700_v60 = vpop.f32.mrf.mxu3 }
 0x266   : > { %v701_v61 = vadd.f32 %v1277_v27, %v700_v60 }
 0x268   : > { %749 = vst.msk [vmem:[%s1284_s22 + $0xc0] sm:$0xff] %vm724_vm1, %v701_v61 }
 0x26d   : > { %v703_v62 = vpop.f32.mrf.mxu3 }
 0x26e   : > { %v704_v63 = vadd.f32 %v1277_v27, %v703_v62 }
 0x270   : > { %750 = vst.msk [vmem:[%s1284_s22 + $0xc8] sm:$0xff] %vm724_vm1, %v704_v63 }
 0x275   : > { %v706_v0 = vpop.f32.mrf.mxu3 }
 0x276   : > { %v707_v1 = vadd.f32 %v1277_v27, %v706_v0 }
 0x278   : > { %751 = vst.msk [vmem:[%s1284_s22 + $0xd0] sm:$0xff] %vm724_vm1, %v707_v1 }
 0x27d   : > { %v709_v2 = vpop.f32.mrf.mxu3 }
 0x27e   : > { %v710_v3 = vadd.f32 %v1277_v27, %v709_v2 }
 0x280   : > { %752 = vst.msk [vmem:[%s1284_s22 + $0xd8] sm:$0xff] %vm724_vm1, %v710_v3 }
 0x285   : > { %v712_v4 = vpop.f32.mrf.mxu3 }
 0x286   : > { %v713_v5 = vadd.f32 %v1277_v27, %v712_v4 }
 0x288   : > { %753 = vst.msk [vmem:[%s1284_s22 + $0xe0] sm:$0xff] %vm724_vm1, %v713_v5 }
 0x28d   : > { %v715_v6 = vpop.f32.mrf.mxu3 }
 0x28e   : > { %v716_v7 = vadd.f32 %v1277_v27, %v715_v6 }
 0x290   : > { %754 = vst.msk [vmem:[%s1284_s22 + $0xe8] sm:$0xff] %vm724_vm1, %v716_v7 }
 0x295   : > { %v718_v8 = vpop.f32.mrf.mxu3 }
 0x296   : > { %v719_v9 = vadd.f32 %v1277_v27, %v718_v8 }
 0x298   : > { %755 = vst.msk [vmem:[%s1284_s22 + $0xf0] sm:$0xff] %vm724_vm1, %v719_v9 }
 0x29d   : > { %v721_v10 = vpop.f32.mrf.mxu3 }
 0x29e   : > { %v722_v11 = vadd.f32 %v1277_v27, %v721_v10 }
 0x2a0   : > { %756 = vst.msk [vmem:[%s1284_s22 + $0xf8] sm:$0xff] %vm724_vm1, %v722_v11 }
 0x2a1 PF: > { %s12_s9 = sadd.s32 1, %s1008_s9  }
 0x2a2   : > { %p9_p4 = scmp.ge.s32.totalorder %s12_s9, 4  }
 0x2a4   :  { %11 = sbr.rel (!%p9_p4) target bundleno = 1 (0x1), region = 61 }

</bundles_post_ra>
